<compile_context>
chip_gen: v5e
topology: v5e:2x2
jax: 0.10.0
libtpu: 0.0.40
codegen_flags: <defaults>
</compile_context>

<pallas_src>
import math

import jax
import jax.numpy as jnp
from jax.experimental import pallas as pl
from jax.experimental.pallas import tpu as pltpu


_GELU_C = math.sqrt(2.0 / math.pi)


def _gelu_new(x):
    # GPT-2 "gelu_new" (tanh approximation), matches transformers ACT2FN["gelu_new"].
    return 0.5 * x * (1.0 + jnp.tanh(_GELU_C * (x + 0.044715 * x * x * x)))


def _round_up(n, m):
    return ((n + m - 1) // m) * m


def _mlp_kernel_fused(x_ref, w1_ref, b1_ref, w2_ref, b2_ref, o_ref):
    # x_ref : (tm, E) bf16   w1_ref: (E, I) bf16   b1_ref: (1, I) f32
    # w2_ref: (I, O)  bf16   b2_ref: (1, O) f32    o_ref : (tm, O)
    h = jnp.dot(x_ref[...], w1_ref[...], preferred_element_type=jnp.float32)
    h = _gelu_new(h + b1_ref[...])
    y = jnp.dot(h.astype(w2_ref.dtype), w2_ref[...],
                preferred_element_type=jnp.float32)
    o_ref[...] = (y + b2_ref[...]).astype(o_ref.dtype)


def _mlp_kernel_split(x_ref, w1_ref, b1_ref, w2_ref, b2_ref, o_ref, acc_ref):
    # Reduction over chunks of the intermediate dim (grid axis 1, "arbitrary").
    # x_ref : (tm, E) bf16   w1_ref: (E, ti) bf16   b1_ref: (1, ti) f32
    # w2_ref: (ti, O) bf16   b2_ref: (1, O)  f32    acc_ref: (tm, O) f32 VMEM
    k = pl.program_id(1)

    @pl.when(k == 0)
    def _():
        acc_ref[...] = jnp.zeros_like(acc_ref)

    h = jnp.dot(x_ref[...], w1_ref[...], preferred_element_type=jnp.float32)
    h = _gelu_new(h + b1_ref[...])
    acc_ref[...] += jnp.dot(h.astype(w2_ref.dtype), w2_ref[...],
                            preferred_element_type=jnp.float32)

    @pl.when(k == pl.num_programs(1) - 1)
    def _():
        o_ref[...] = (acc_ref[...] + b2_ref[...]).astype(o_ref.dtype)


def gpt2_mlp(hidden_states, w_fc, b_fc, w_proj, b_proj, *,
             tm=256, ti=None, compute_dtype=jnp.bfloat16):
    """hidden_states: (B, T, E); w_fc: (E, I); b_fc: (I,); w_proj: (I, O); b_proj: (O,)."""
    B, T, E = hidden_states.shape
    I = w_fc.shape[1]
    O = w_proj.shape[1]
    M = B * T
    out_dtype = hidden_states.dtype

    # Row tile: 256 pipelines well and fills the MXU on v6e/v7x; shrink (in
    # multiples of 16 sublanes for bf16 packing) for tiny problems. Pad M so
    # arbitrary (B, T) (decode steps, odd batches) work.
    tm = min(tm, _round_up(M, 16))
    tm = _round_up(tm, 16)
    Mp = _round_up(M, tm)

    # Intermediate-dim chunk: default keeps both weight matrices resident
    # (fine for GPT-2-small/medium layers in bf16). Pass ti (multiple of 128
    # dividing I) to bound weight VMEM for very large intermediates.
    if ti is None:
        ti = I
    assert ti == I or (ti % 128 == 0 and I % ti == 0), (ti, I)

    x2d = hidden_states.reshape(M, E).astype(compute_dtype)
    if Mp != M:
        x2d = jnp.pad(x2d, ((0, Mp - M), (0, 0)))

    w_fc_c = w_fc.astype(compute_dtype)
    w_proj_c = w_proj.astype(compute_dtype)
    b_fc2d = b_fc.reshape(1, I).astype(jnp.float32)
    b_proj2d = b_proj.reshape(1, O).astype(jnp.float32)

    itemsize = jnp.dtype(compute_dtype).itemsize
    cost = pl.CostEstimate(
        flops=2 * Mp * (E * I + I * O),
        transcendentals=Mp * I,
        bytes_accessed=(Mp * E + E * I + I * O) * itemsize
        + (I + O) * 4
        + Mp * O * jnp.dtype(out_dtype).itemsize,
    )
    compiler_params_common = dict(vmem_limit_bytes=64 * 1024 * 1024)

    if ti == I:
        # Fast path: no reduction axis, weights stay resident across row steps.
        grid_spec = pltpu.PrefetchScalarGridSpec(
            num_scalar_prefetch=0,
            grid=(Mp // tm,),
            in_specs=[
                pl.BlockSpec((tm, E), lambda i: (i, 0)),   # x row tile
                pl.BlockSpec((E, I), lambda i: (0, 0)),    # W_fc (resident)
                pl.BlockSpec((1, I), lambda i: (0, 0)),    # b_fc
                pl.BlockSpec((I, O), lambda i: (0, 0)),    # W_proj (resident)
                pl.BlockSpec((1, O), lambda i: (0, 0)),    # b_proj
            ],
            out_specs=pl.BlockSpec((tm, O), lambda i: (i, 0)),
        )
        kernel = _mlp_kernel_fused
        compiler_params = pltpu.CompilerParams(
            dimension_semantics=("parallel",), **compiler_params_common)
    else:
        grid_spec = pltpu.PrefetchScalarGridSpec(
            num_scalar_prefetch=0,
            grid=(Mp // tm, I // ti),
            in_specs=[
                pl.BlockSpec((tm, E), lambda i, k: (i, 0)),   # x row tile
                pl.BlockSpec((E, ti), lambda i, k: (0, k)),   # W_fc chunk
                pl.BlockSpec((1, ti), lambda i, k: (0, k)),   # b_fc chunk
                pl.BlockSpec((ti, O), lambda i, k: (k, 0)),   # W_proj chunk
                pl.BlockSpec((1, O), lambda i, k: (0, 0)),    # b_proj
            ],
            out_specs=pl.BlockSpec((tm, O), lambda i, k: (i, 0)),
            scratch_shapes=[pltpu.VMEM((tm, O), jnp.float32)],
        )
        kernel = _mlp_kernel_split
        compiler_params = pltpu.CompilerParams(
            dimension_semantics=("parallel", "arbitrary"), **compiler_params_common)

    out2d = pl.pallas_call(
        kernel,
        out_shape=jax.ShapeDtypeStruct((Mp, O), out_dtype),
        grid_spec=grid_spec,
        compiler_params=compiler_params,
        cost_estimate=cost,
    )(x2d, w_fc_c, b_fc2d, w_proj_c, b_proj2d)

    if Mp != M:
        out2d = out2d[:M]
    return out2d.reshape(B, T, O)


def gpt2_mlp_ref(hidden_states, w_fc, b_fc, w_proj, b_proj):
    h = hidden_states @ w_fc + b_fc
    h = _gelu_new(h)
    return h @ w_proj + b_proj


if __name__ == "__main__":
    # Small shapes consistent with the module: (B, T, E) input,
    # embed_dim=32, ind_dim=64, output_dim=32.
    B, T, E, I, O = 2, 8, 32, 64, 32

    key = jax.random.PRNGKey(0)
    k_x, k_w1, k_b1, k_w2, k_b2 = jax.random.split(key, 5)

    x = jax.random.normal(k_x, (B, T, E), dtype=jnp.float32)
    # Deterministic param init (nn.Linear-like scale), stored as (in, out).
    w_fc = jax.random.normal(k_w1, (E, I), dtype=jnp.float32) / math.sqrt(E)
    b_fc = jax.random.normal(k_b1, (I,), dtype=jnp.float32) * 0.01
    w_proj = jax.random.normal(k_w2, (I, O), dtype=jnp.float32) / math.sqrt(I)
    b_proj = jax.random.normal(k_b2, (O,), dtype=jnp.float32) * 0.01

    out = gpt2_mlp(x, w_fc, b_fc, w_proj, b_proj)
    out = jax.block_until_ready(out)

    ref = gpt2_mlp_ref(x, w_fc, b_fc, w_proj, b_proj)
    assert out.shape == (B, T, O), out.shape
    # bf16 matmuls (f32 accumulation) vs the f32 reference: ~1e-2-level
    # divergence is expected from the cast, not a bug.
    max_err = float(jnp.max(jnp.abs(out - ref)))
    assert jnp.allclose(out, ref, atol=3e-2, rtol=3e-2), max_err

    print("KERNEL_OK")
</pallas_src>

<mosaic_0001>
module attributes {stable_mosaic.version = 11 : i64} {
  func.func @_mlp_kernel_fused(%arg0: i32, %arg1: memref<16x32xbf16, #tpu.memory_space<vmem>>, %arg2: memref<32x64xbf16, #tpu.memory_space<vmem>>, %arg3: memref<1x64xf32, #tpu.memory_space<vmem>>, %arg4: memref<64x32xbf16, #tpu.memory_space<vmem>>, %arg5: memref<1x32xf32, #tpu.memory_space<vmem>>, %arg6: memref<16x32xf32, #tpu.memory_space<vmem>>) attributes {dimension_semantics = [#tpu.dimension_semantics<parallel>], iteration_bounds = array<i64: 1>, scalar_prefetch = 0 : i64, scratch_operands = 0 : i64, tpu.core_type = #tpu.core_type<tc>, window_params = [{transform_indices = @transform_0, window_bounds = array<i64: 16, 32>}, {pipeline_mode = #tpu.pipeline_mode<synchronous>, transform_indices = @transform_1, window_bounds = array<i64: 32, 64>}, {pipeline_mode = #tpu.pipeline_mode<synchronous>, transform_indices = @transform_2, window_bounds = array<i64: 1, 64>}, {pipeline_mode = #tpu.pipeline_mode<synchronous>, transform_indices = @transform_3, window_bounds = array<i64: 64, 32>}, {pipeline_mode = #tpu.pipeline_mode<synchronous>, transform_indices = @transform_4, window_bounds = array<i64: 1, 32>}, {transform_indices = @transform_5, window_bounds = array<i64: 16, 32>}]} {
    %c0 = arith.constant 0 : index
    %c0_0 = arith.constant 0 : index
    %0 = vector.load %arg1[%c0, %c0_0] : memref<16x32xbf16, #tpu.memory_space<vmem>>, vector<16x32xbf16>
    %c0_1 = arith.constant 0 : index
    %c0_2 = arith.constant 0 : index
    %1 = vector.load %arg2[%c0_1, %c0_2] : memref<32x64xbf16, #tpu.memory_space<vmem>>, vector<32x64xbf16>
    %cst = arith.constant dense<0.000000e+00> : vector<16x64xf32>
    %2 = tpu.matmul %0, %1, %cst {dimension_numbers = #tpu.dot_dimension_numbers<[1], [0], [0], [1], [0, 0, 1, 1], [], []>} : vector<16x32xbf16>, vector<32x64xbf16>, vector<16x64xf32> -> vector<16x64xf32>
    %c0_3 = arith.constant 0 : index
    %c0_4 = arith.constant 0 : index
    %3 = vector.load %arg3[%c0_3, %c0_4] : memref<1x64xf32, #tpu.memory_space<vmem>>, vector<1x64xf32>
    %4 = vector.broadcast %3 : vector<1x64xf32> to vector<16x64xf32>
    %5 = arith.addf %2, %4 : vector<16x64xf32>
    %cst_5 = arith.constant 5.000000e-01 : f32
    %6 = vector.broadcast %cst_5 : f32 to vector<16x64xf32>
    %7 = arith.mulf %6, %5 : vector<16x64xf32>
    %cst_6 = arith.constant 4.471500e-02 : f32
    %8 = vector.broadcast %cst_6 : f32 to vector<16x64xf32>
    %9 = arith.mulf %8, %5 : vector<16x64xf32>
    %10 = arith.mulf %9, %5 : vector<16x64xf32>
    %11 = arith.mulf %10, %5 : vector<16x64xf32>
    %12 = arith.addf %5, %11 : vector<16x64xf32>
    %cst_7 = arith.constant 0.797884583 : f32
    %13 = vector.broadcast %cst_7 : f32 to vector<16x64xf32>
    %14 = arith.mulf %13, %12 : vector<16x64xf32>
    %15 = math.tanh %14 : vector<16x64xf32>
    %cst_8 = arith.constant 1.000000e+00 : f32
    %16 = vector.broadcast %cst_8 : f32 to vector<16x64xf32>
    %17 = arith.addf %16, %15 : vector<16x64xf32>
    %18 = arith.mulf %7, %17 : vector<16x64xf32>
    %19 = arith.truncf %18 : vector<16x64xf32> to vector<16x64xbf16>
    %c0_9 = arith.constant 0 : index
    %c0_10 = arith.constant 0 : index
    %20 = vector.load %arg4[%c0_9, %c0_10] : memref<64x32xbf16, #tpu.memory_space<vmem>>, vector<64x32xbf16>
    %cst_11 = arith.constant dense<0.000000e+00> : vector<16x32xf32>
    %21 = tpu.matmul %19, %20, %cst_11 {dimension_numbers = #tpu.dot_dimension_numbers<[1], [0], [0], [1], [0, 0, 1, 1], [], []>} : vector<16x64xbf16>, vector<64x32xbf16>, vector<16x32xf32> -> vector<16x32xf32>
    %c0_12 = arith.constant 0 : index
    %c0_13 = arith.constant 0 : index
    %22 = vector.load %arg5[%c0_12, %c0_13] : memref<1x32xf32, #tpu.memory_space<vmem>>, vector<1x32xf32>
    %23 = vector.broadcast %22 : vector<1x32xf32> to vector<16x32xf32>
    %24 = arith.addf %21, %23 : vector<16x32xf32>
    %c0_14 = arith.constant 0 : index
    %c0_15 = arith.constant 0 : index
    %25 = vector.load %arg6[%c0_14, %c0_15] : memref<16x32xf32, #tpu.memory_space<vmem>>, vector<16x32xf32>
    tpu.vector_store %arg6[%c0_14, %c0_15], %24 {strides = array<i32>} : memref<16x32xf32, #tpu.memory_space<vmem>>, vector<16x32xf32>,
    return
  }
  func.func @transform_0(%arg0: i32) -> (i32, i32) {
    %c0_i32 = arith.constant 0 : i32
    %c0_i32_0 = arith.constant 0 : i32
    return %arg0, %c0_i32 : i32, i32
  }
  func.func @transform_1(%arg0: i32) -> (i32, i32) {
    %c0_i32 = arith.constant 0 : i32
    %c0_i32_0 = arith.constant 0 : i32
    %c0_i32_1 = arith.constant 0 : i32
    return %c0_i32, %c0_i32_0 : i32, i32
  }
  func.func @transform_2(%arg0: i32) -> (i32, i32) {
    %c0_i32 = arith.constant 0 : i32
    %c0_i32_0 = arith.constant 0 : i32
    %c0_i32_1 = arith.constant 0 : i32
    return %c0_i32, %c0_i32_0 : i32, i32
  }
  func.func @transform_3(%arg0: i32) -> (i32, i32) {
    %c0_i32 = arith.constant 0 : i32
    %c0_i32_0 = arith.constant 0 : i32
    %c0_i32_1 = arith.constant 0 : i32
    return %c0_i32, %c0_i32_0 : i32, i32
  }
  func.func @transform_4(%arg0: i32) -> (i32, i32) {
    %c0_i32 = arith.constant 0 : i32
    %c0_i32_0 = arith.constant 0 : i32
    %c0_i32_1 = arith.constant 0 : i32
    return %c0_i32, %c0_i32_0 : i32, i32
  }
  func.func @transform_5(%arg0: i32) -> (i32, i32) {
    %c0_i32 = arith.constant 0 : i32
    %c0_i32_0 = arith.constant 0 : i32
    return %arg0, %c0_i32 : i32, i32
  }
}

</mosaic_0001>

<bundles_post_ra>
// kernel: tpu_custom_call.1
= control target key start
LH: loop header
LB: loop body
LE: loop exit
PB: predicated region body
PF: predicated region fallthrough
CT: control target
= control target key end

     0   :  { %s298_s0 = inlined_call_operand.vmem [shape: bf16[16,32], index: 0, kind: input, shape index: {}]   ;;  %s299_s1 = inlined_call_operand.vmem [shape: bf16[32,64], index: 1, kind: input, shape index: {}]   ;;  %s300_s2 = inlined_call_operand.vmem [shape: f32[1,64], index: 2, kind: input, shape index: {}]   ;;  %s301_s3 = inlined_call_operand.vmem [shape: bf16[64,32], index: 3, kind: input, shape index: {}]   ;;  %s302_s4 = inlined_call_operand.vmem [shape: f32[1,32], index: 4, kind: input, shape index: {}]   ;;  %s303_s5 = inlined_call_operand.hbm [shape: f32[16,32], index: 5, kind: output, shape index: {}]  }
   0x1   :  { %v192_v0 = vld [vmem:[%s299_s1 + $0x8] sm:$0xff]  ;;  %v191_v1 = vld [vmem:[%s299_s1] sm:$0xff] }
   0x2   :  { %59 = vmatpush.bf16.msra.mxu0 %v192_v0 }
   0x3   :  { %10 = vsyncpa [#allocation3], 0  ;;  %v190_v2 = vld [vmem:[%s298_s0] sm:$0xff]  ;;  %vm49_vm0 = vcmask 261120   ;;  %v196_v3 = vld [vmem:[%s301_s3 + $0x18] sm:$0xff]  ;;  %vm122_vm1 = vcmask 523264  }
   0x4   :  { %130 = vmatpush.bf16.msra.mxu1 %v196_v3  ;;  %v195_v4 = vld [vmem:[%s301_s3 + $0x10] sm:$0xff]  ;;  %v194_v5 = vld [vmem:[%s301_s3 + $0x8] sm:$0xff]  ;;  %v193_v6 = vld [vmem:[%s301_s3] sm:$0xff]  ;;  %s232_s7 = smov [#allocation2]   ;;  %s148_s11 = sshll.u32 %s303_s5, 4  ;;  %s149_s11 = int_to_ptr.hbm [resolvable:$true] %s148_s11 }
   0x5   :  { %v200_v7 = vld [vmem:[%s300_s2] ss:$0 sm:$0xff]  ;;  %s146_s8 = sshll.u32 %s232_s7, 4  ;;  %s233_s12 = smov 128   ;;  %s147_s8 = int_to_ptr.vmem [resolvable:$true] %s146_s8 }
   0x6   :  { %60 = vmatpush.bf16.msra.mxu0 %v191_v1  ;;  %v201_v31 = vld [vmem:[%s302_s4] ss:$0 sm:$0xff]  ;;  %s234_s13 = smov 8  }
   0x8   :  { %131 = vmatpush.bf16.msra.mxu1 %v195_v4 }
   0x9   :  { %172 = vmatmul.msk.bf16.vlgmr.msra.gmra.mxu0 %vm49_vm0, %v190_v2 }
   0xc   :  { %132 = vmatpush.bf16.msra.mxu1 %v194_v5 }
  0x10   :  { %133 = vmatpush.bf16.msra.mxu1 %v193_v6 }
  0x86   :  { %v62_v8 = vpop.f32.mrf.mxu0 }
  0x87   :  { %v63_v9 = vadd.f32 %v200_v7, %v62_v8 }
  0x89   :  { %v69_v10 = vmul.f32 0.044715, %v63_v9  ;;  %v67_v25 = vmul.f32 0.5, %v63_v9 }
  0x8b   :  { %v71_v11 = vmul.f32 %v69_v10, %v63_v9 }
  0x8d   :  { %v73_v12 = vmul.f32 %v71_v11, %v63_v9 }
  0x8e   :  { %v64_v13 = vpop.f32.mrf.mxu0 }
  0x8f   :  { %v65_v14 = vadd.f32 %v200_v7, %v64_v13  ;;  %v75_v15 = vadd.f32 %v73_v12, %v63_v9 }
  0x91   :  { %v70_v16 = vmul.f32 0.044715, %v65_v14  ;;  %v77_v18 = vmul.f32 0.7978846, %v75_v15  ;;  %v68_v26 = vmul.f32 0.5, %v65_v14 }
  0x93   :  { %v72_v17 = vmul.f32 %v70_v16, %v65_v14  ;;  %202 = vtanh.f32 %v77_v18 }
  0x95   :  { %v74_v19 = vmul.f32 %v72_v17, %v65_v14 }
  0x97   :  { %v76_v20 = vadd.f32 %v74_v19, %v65_v14 }
  0x99   :  { %v78_v21 = vmul.f32 0.7978846, %v76_v20  ;;  %v203_v22 = vpop.eup %202 }
  0x9a   :  { %v81_v23 = vadd.f32 1.0, %v203_v22 }
  0x9b   :  { %204 = vtanh.f32 %v78_v21 }
  0x9c   :  { %v83_v28 = vmul.f32 %v81_v23, %v67_v25 }
  0xa1   :  { %v205_v24 = vpop.eup %204 }
  0xa2   :  { %v82_v27 = vadd.f32 1.0, %v205_v24 }
  0xa4   :  { %v84_v29 = vmul.f32 %v82_v27, %v68_v26 }
  0xa6   :  { %v85_v30 = vpack.c.bf16 %v84_v29, %v83_v28 }
  0xa8   :  { %189 = vmatmul.msk.bf16.vlgmr.msra.gmra.mxu1 %vm122_vm1, %v85_v30 }
 0x125   :  { %v135_v32 = vpop.f32.mrf.mxu1 }
 0x126   :  { %v136_v33 = vadd.f32 %v201_v31, %v135_v32 }
 0x128   :  { %140 = vst.msk [vmem:[#allocation2] sm:$0xff] %vm49_vm0, %v136_v33 }
 0x12d   :  { %v137_v34 = vpop.f32.mrf.mxu1 }
 0x12e   :  { %v138_v35 = vadd.f32 %v201_v31, %v137_v34 }
 0x130   :  { %141 = vst.msk [vmem:[#allocation2 + $0x8] sm:$0xff] %vm49_vm0, %v138_v35 }
 0x131   :  { %154 = dma.vmem_to_hbm [thread:$0]  %s147_s8, 256, %s149_s11, [#allocation3], %s233_s12, %s233_s12, %s234_s13  }
 0x132   :  { %230 = dma.done.wait [#allocation3], 256  }
 0x133   :  { %231 = vsyncadd [#allocation3], 4294967040 }
 0x134   :  { %159 = vsyncpa [#allocation3], 1 }

</bundles_post_ra>
